<compile_context>
chip_gen: v6e
topology: v6e:2x2x1
jax: 0.10.0
libtpu: 0.0.40
codegen_flags: <defaults>
</compile_context>

<pallas_src>
import numpy as np

import jax
import jax.numpy as jnp
from jax import lax
from jax.experimental import pallas as pl
from jax.experimental.pallas import tpu as pltpu

EPS = 1e-5
CP = 8        # channels padded to a multiple of 8 (sublane tile)
LANE = 128    # flattened volumes padded to a multiple of 128 (lane tile)


def _ceil_to(n, m):
    return ((n + m - 1) // m) * m


# -----------------------------------------------------------------------------
# pltpu.roll convention probe (lazy: runs once, on first use)
# -----------------------------------------------------------------------------
_ROLL_MATCHES_JNP = None


def _probe_roll_convention():
    """pltpu.roll is expected to follow jnp.roll semantics
    (roll(x, s)[i] == x[i - s]); probe it once so static shifts stay correct."""
    global _ROLL_MATCHES_JNP
    if _ROLL_MATCHES_JNP is None:
        def k(x_ref, o_ref):
            o_ref[...] = pltpu.roll(x_ref[...], 1, axis=1)

        x = jnp.broadcast_to(jnp.arange(128, dtype=jnp.float32)[None, :], (8, 128))
        y = pl.pallas_call(k, out_shape=jax.ShapeDtypeStruct((8, 128), jnp.float32))(x)
        _ROLL_MATCHES_JNP = bool(float(y[0, 0]) == 127.0)
    return _ROLL_MATCHES_JNP


def _lane_shift(delta, lanes):
    """Roll amount so that roll(x, amount, axis=-1)[..., i] == x[..., i + delta]."""
    if _probe_roll_convention():
        return int((-delta) % lanes)
    return int(delta % lanes)


# -----------------------------------------------------------------------------
# Geometry of one "block + maxpool(4,2,2)" stage
# -----------------------------------------------------------------------------
def _stage_geom(D, H, W, pool_pad):
    pd, ph, pw = pool_pad
    oD = (D + 2 * pd - 4) // 4 + 1
    oH = (H + 2 * ph - 2) // 2 + 1
    oW = (W + 2 * pw - 2) // 2 + 1
    # Halo big enough for the 3x3x3 "same" convs AND the fused pool window.
    hd = max(1, pd, 4 * oD - pd - D)
    hh = max(1, ph, 2 * oH - ph - H)
    hw = max(1, pw, 2 * oW - pw - W)
    Dp, Hp, Wp = D + 2 * hd, H + 2 * hh, W + 2 * hw
    S = Hp * Wp
    P = Dp * S
    Pp = _ceil_to(P, LANE)
    return dict(D=D, H=H, W=W, oD=oD, oH=oH, oW=oW, pd=pd, ph=ph, pw=pw,
                hd=hd, hh=hh, hw=hw, Dp=Dp, Hp=Hp, Wp=Wp, S=S, P=P, Pp=Pp)


# -----------------------------------------------------------------------------
# Lane-roll schedules (match the weight packing order: kd outer, kh, kw, ci)
# -----------------------------------------------------------------------------
def _conv_shifts(S, Wp, Pp):                 # 3x3x3 "same" conv taps
    return tuple(_lane_shift((kd - 1) * S + (kh - 1) * Wp + (kw - 1), Pp)
                 for kd in range(3) for kh in range(3) for kw in range(3))


def _valid_conv_shifts(S, Wp, Pp):           # 3x3x3 VALID conv taps
    return tuple(_lane_shift(kd * S + kh * Wp + kw, Pp)
                 for kd in range(3) for kh in range(3) for kw in range(3))


def _pool_shifts(S, Wp, Pp):                 # MaxPool3d (4,2,2) window offsets
    return tuple(_lane_shift(dd * S + dh * Wp + dw, Pp)
                 for dd in range(4) for dh in range(2) for dw in range(2))


# -----------------------------------------------------------------------------
# Compile-time constants (numpy -> literals; zero runtime glue)
# -----------------------------------------------------------------------------
def _mask_np(g):
    """(1, Pp) validity mask: 1 at data voxels, 0 on halo / lane tail."""
    m = np.zeros((g["Dp"], g["Hp"], g["Wp"]), np.float32)
    m[g["hd"]:g["hd"] + g["D"], g["hh"]:g["hh"] + g["H"],
      g["hw"]:g["hw"] + g["W"]] = 1.0
    out = np.zeros((1, g["Pp"]), np.float32)
    out[0, :g["P"]] = m.reshape(-1)
    return out


def _pool_gather_np(g, n_cols):
    """(Pp, n_cols) one-hot: column k picks the pool-window origin of the k-th
    pooled voxel (row-major over (oD, oH, oW)) from the flattened frame."""
    G = np.zeros((g["Pp"], n_cols), np.float32)
    d0, h0, w0 = g["hd"] - g["pd"], g["hh"] - g["ph"], g["hw"] - g["pw"]
    k = 0
    for od in range(g["oD"]):
        for oh in range(g["oH"]):
            for ow in range(g["oW"]):
                src = (d0 + 4 * od) * g["S"] + (h0 + 2 * oh) * g["Wp"] + (w0 + 2 * ow)
                G[src, k] = 1.0
                k += 1
    return G


def _expand_np(g_prev, g_next, n_rows):
    """(n_rows, Pp_next) one-hot: row k scatters the k-th pooled voxel of the
    previous stage into the zero-halo frame of the next stage."""
    E = np.zeros((n_rows, g_next["Pp"]), np.float32)
    k = 0
    for od in range(g_prev["oD"]):
        for oh in range(g_prev["oH"]):
            for ow in range(g_prev["oW"]):
                dst = ((g_next["hd"] + od) * g_next["S"]
                       + (g_next["hh"] + oh) * g_next["Wp"]
                       + (g_next["hw"] + ow))
                E[k, dst] = 1.0
                k += 1
    return E


# -----------------------------------------------------------------------------
# The fused whole-network kernel (one batch item per grid step)
# -----------------------------------------------------------------------------
def _make_fused_kernel(shifts1, pshifts1, shifts2, pshifts2, shiftsF):
    bf16 = jnp.bfloat16

    def im2col(xb, shifts):
        # xb: (C_p, Pp) bf16 -> (27*C_p, Pp) bf16, tap order (kd, kh, kw, ci)
        cols = [xb if s == 0 else pltpu.roll(xb, s, axis=1) for s in shifts]
        return jnp.concatenate(cols, axis=0)

    def res_block(xb, w_ref, b_ref, m, shifts):
        # xb bf16 (C_p, Pp); w_ref (3, C_p, 27*C_p) bf16; b_ref (3, C_p, 1) f32
        def conv(inp_b, i):
            xcol = im2col(inp_b, shifts)
            return jnp.dot(w_ref[i], xcol,
                           preferred_element_type=jnp.float32) + b_ref[i]

        x1 = jnp.maximum(conv(xb, 0), 0.0) * m                  # relu(bn(conv1))
        x2 = jnp.maximum(conv(x1.astype(bf16), 1), 0.0) * m     # relu(bn(conv2))
        x3 = conv(x2.astype(bf16), 2)                           # bn(conv3)
        return (jnp.maximum(x1 + x3, 0.0) * m).astype(bf16)     # relu(x1 + x3)

    def pool_field(act_b, shifts):
        # act_b is post-ReLU (>= 0), so the zero halo == -inf pooling padding.
        f = act_b
        for s in shifts:
            if s != 0:
                f = jnp.maximum(f, pltpu.roll(act_b, s, axis=1))
        return f                                                # window-max field

    def kernel(xf_ref, m1_ref, w1_ref, b1_ref, p1g_ref, e1_ref,
               m2_ref, w2_ref, b2_ref, p2g_ref, wf_ref, o_ref):
        # ---- block1 + maxpool1 (frame 1, all in VMEM) ----
        act1 = res_block(xf_ref[0].astype(bf16), w1_ref, b1_ref,
                         m1_ref[...], shifts1)
        f1 = pool_field(act1, pshifts1)
        pooled1 = jnp.dot(f1, p1g_ref[...],                      # (C_p, Np1)
                          preferred_element_type=jnp.float32)
        # ---- scatter pooled voxels into block2's zero-halo frame (frame 2) ----
        x2in = jnp.dot(pooled1.astype(bf16), e1_ref[...],
                       preferred_element_type=jnp.float32).astype(bf16)
        # ---- block2 + maxpool2 ----
        act2 = res_block(x2in, w2_ref, b2_ref, m2_ref[...], shifts2)
        f2 = pool_field(act2, pshifts2)
        x3in = jnp.dot(f2, p2g_ref[...],                         # (C_p, Pp3)
                       preferred_element_type=jnp.float32).astype(bf16)
        # ---- final VALID 3x3x3 conv (32 output channels, no bias) ----
        xcol = im2col(x3in, shiftsF)
        o_ref[0] = jnp.dot(wf_ref[...], xcol, preferred_element_type=jnp.float32)

    return kernel


# -----------------------------------------------------------------------------
# Host-side, one-time parameter packing (BN folded, bf16 MXU operands)
# -----------------------------------------------------------------------------
def _pack_conv_weight(w, cin_p, cout_p, scale=None):
    """(Cout, Cin, 3, 3, 3) torch-layout weights -> (cout_p, 27*cin_p), with the
    BN scale folded in.  Column order (kd, kh, kw, ci) matches the im2col."""
    cout, cin = w.shape[:2]
    if scale is not None:
        w = w * scale[:, None, None, None, None]
    w = jnp.pad(w, ((0, cout_p - cout), (0, cin_p - cin), (0, 0), (0, 0), (0, 0)))
    w = jnp.transpose(w, (0, 2, 3, 4, 1))            # (cout_p, kd, kh, kw, cin_p)
    return w.reshape(cout_p, 27 * cin_p).astype(jnp.float32)


def pack_params(params):
    """Call ONCE outside jit: fold inference BN into weights and pack for MXU."""
    for block in (params["block1"], params["block2"]):
        for p in block:
            assert p["w"].shape[0] <= CP and p["w"].shape[1] <= CP

    def pack_block(block):
        ws = [_pack_conv_weight(p["w"], CP, CP, p["scale"]) for p in block]
        bs = [jnp.pad(p["shift"], (0, CP - p["shift"].shape[0])).reshape(CP, 1)
              for p in block]
        return (jnp.stack(ws).astype(jnp.bfloat16),        # (3, CP, 27*CP)
                jnp.stack(bs).astype(jnp.float32))          # (3, CP, 1)

    w1, b1 = pack_block(params["block1"])
    w2, b2 = pack_block(params["block2"])
    wf = _pack_conv_weight(params["conv_w"], CP,
                           params["conv_w"].shape[0]).astype(jnp.bfloat16)
    return {"w1": w1, "b1": b1, "w2": w2, "b2": b2, "wf": wf}


# -----------------------------------------------------------------------------
# Forward pass: input framing glue + ONE pallas_call + output crop
# -----------------------------------------------------------------------------
def d_res_3d_cnn_fwd(x, packed):
    """x: (B, D, H, W) float32 -- the PyTorch input before `unsqueeze(1)`."""
    B, D, H, W = x.shape
    g1 = _stage_geom(D, H, W, (0, 1, 1))                 # block1 + maxpool1
    g2 = _stage_geom(g1["oD"], g1["oH"], g1["oW"], (2, 1, 1))  # block2 + maxpool2
    D3, H3, W3 = g2["oD"], g2["oH"], g2["oW"]            # final-conv input extent
    assert D3 >= 3 and H3 >= 3 and W3 >= 3, "input too small for the final conv"
    n1 = g1["oD"] * g1["oH"] * g1["oW"]
    Np1 = _ceil_to(n1, LANE)
    P3 = D3 * H3 * W3
    Pp3 = _ceil_to(P3, LANE)

    # Compile-time constants (numpy -> literals): masks + one-hot repack mats.
    m1 = jnp.asarray(_mask_np(g1))
    m2 = jnp.asarray(_mask_np(g2))
    p1g = jnp.asarray(_pool_gather_np(g1, Np1), dtype=jnp.bfloat16)
    e1 = jnp.asarray(_expand_np(g1, g2, Np1), dtype=jnp.bfloat16)
    p2g = jnp.asarray(_pool_gather_np(g2, Pp3), dtype=jnp.bfloat16)

    shifts1 = _conv_shifts(g1["S"], g1["Wp"], g1["Pp"])
    pshifts1 = _pool_shifts(g1["S"], g1["Wp"], g1["Pp"])
    shifts2 = _conv_shifts(g2["S"], g2["Wp"], g2["Pp"])
    pshifts2 = _pool_shifts(g2["S"], g2["Wp"], g2["Pp"])
    shiftsF = _valid_conv_shifts(H3 * W3, W3, Pp3)

    # Embed the input volume in its zero-halo frame (channel- and lane-padded).
    xf = jnp.pad(x.astype(jnp.float32)[:, None],
                 ((0, 0), (0, CP - 1),
                  (g1["hd"], g1["hd"]), (g1["hh"], g1["hh"]), (g1["hw"], g1["hw"])))
    xf = jnp.pad(xf.reshape(B, CP, g1["P"]), ((0, 0), (0, 0), (0, g1["Pp"] - g1["P"])))

    w1, b1, w2, b2, wf = (packed["w1"], packed["b1"], packed["w2"],
                          packed["b2"], packed["wf"])
    cout = wf.shape[0]

    def full(shape):
        return pl.BlockSpec(shape, lambda b: (0,) * len(shape))

    kernel = _make_fused_kernel(shifts1, pshifts1, shifts2, pshifts2, shiftsF)
    out = pl.pallas_call(
        kernel,
        out_shape=jax.ShapeDtypeStruct((B, cout, Pp3), jnp.float32),
        grid_spec=pltpu.PrefetchScalarGridSpec(
            num_scalar_prefetch=0,
            grid=(B,),
            in_specs=[
                pl.BlockSpec((1, CP, g1["Pp"]), lambda b: (b, 0, 0)),  # x frame
                full((1, g1["Pp"])),                                   # mask1
                full(tuple(w1.shape)), full(tuple(b1.shape)),          # block1
                full((g1["Pp"], Np1)), full((Np1, g2["Pp"])),          # pool1 repack
                full((1, g2["Pp"])),                                   # mask2
                full(tuple(w2.shape)), full(tuple(b2.shape)),          # block2
                full((g2["Pp"], Pp3)),                                 # pool2 gather
                full(tuple(wf.shape)),                                 # final conv
            ],
            out_specs=pl.BlockSpec((1, cout, Pp3), lambda b: (b, 0, 0)),
        ),
        compiler_params=pltpu.CompilerParams(
            dimension_semantics=("parallel",),       # batch -> both TCs on v7x
            vmem_limit_bytes=48 * 1024 * 1024),
    )(xf, m1, w1, b1, p1g, e1, m2, w2, b2, p2g, wf)

    # Crop the VALID-conv output region and flatten (== torch .view(B, -1)).
    out = out[:, :, :P3].reshape(B, cout, D3, H3, W3)
    out = out[:, :, :D3 - 2, :H3 - 2, :W3 - 2]
    return out.reshape(B, -1)


# -----------------------------------------------------------------------------
# Model parameters (inference-mode BatchNorm statistics)
# -----------------------------------------------------------------------------
def init_conv_bn(key, cin, cout):
    kw, kg, kb, km, kv = jax.random.split(key, 5)
    fan_in = cin * 27
    w = jax.random.normal(kw, (cout, cin, 3, 3, 3), jnp.float32) * (2.0 / fan_in) ** 0.5
    gamma = jax.random.uniform(kg, (cout,), jnp.float32, 0.5, 1.5)
    beta = 0.1 * jax.random.normal(kb, (cout,), jnp.float32)
    running_mean = 0.1 * jax.random.normal(km, (cout,), jnp.float32)
    running_var = jax.random.uniform(kv, (cout,), jnp.float32, 0.5, 1.5)
    scale = gamma / jnp.sqrt(running_var + EPS)          # inference-mode BN fold
    shift = beta - running_mean * scale
    return {"w": w, "scale": scale, "shift": shift}


def init_params(key, in_channel=1, out_channel1=4, out_channel2=8):
    ks = jax.random.split(key, 7)
    block1 = (init_conv_bn(ks[0], in_channel, out_channel1),
              init_conv_bn(ks[1], out_channel1, out_channel1),
              init_conv_bn(ks[2], out_channel1, out_channel1))
    block2 = (init_conv_bn(ks[3], out_channel1, out_channel2),
              init_conv_bn(ks[4], out_channel2, out_channel2),
              init_conv_bn(ks[5], out_channel2, out_channel2))
    fan_in = out_channel2 * 27
    conv_w = jax.random.normal(ks[6], (32, out_channel2, 3, 3, 3),
                               jnp.float32) * (2.0 / fan_in) ** 0.5
    return {"block1": block1, "block2": block2, "conv_w": conv_w}


# -----------------------------------------------------------------------------
# Pure-JAX reference (correctness oracle, f32 end-to-end)
# -----------------------------------------------------------------------------
def reference_fwd(x, params):
    dn = ("NCDHW", "OIDHW", "NCDHW")

    def conv_bn(x, p, relu):
        y = lax.conv_general_dilated(x, p["w"], (1, 1, 1), [(1, 1)] * 3,
                                     dimension_numbers=dn)
        y = y * p["scale"][None, :, None, None, None] \
            + p["shift"][None, :, None, None, None]
        return jnp.maximum(y, 0.0) if relu else y

    def block(x, ps):
        x1 = conv_bn(x, ps[0], True)
        x2 = conv_bn(x1, ps[1], True)
        x3 = conv_bn(x2, ps[2], False)
        return jnp.maximum(x1 + x3, 0.0)

    def pool(x, pad):
        pd, ph, pw = pad
        return lax.reduce_window(x, -jnp.inf, lax.max,
                                 (1, 1, 4, 2, 2), (1, 1, 4, 2, 2),
                                 [(0, 0), (0, 0), (pd, pd), (ph, ph), (pw, pw)])

    B = x.shape[0]
    x = x[:, None]
    x = pool(block(x, params["block1"]), (0, 1, 1))
    x = pool(block(x, params["block2"]), (2, 1, 1))
    y = lax.conv_general_dilated(x, params["conv_w"], (1, 1, 1), "VALID",
                                 dimension_numbers=dn)
    return y.reshape(B, -1)


# -----------------------------------------------------------------------------
if __name__ == "__main__":
    _probe_roll_convention()           # resolve pltpu.roll sign convention once

    key = jax.random.PRNGKey(0)
    kp, kx = jax.random.split(key)
    # D_Res_3d_CNN(in_channel=1, out_channel1=4, out_channel2=8)
    params = init_params(kp, in_channel=1, out_channel1=4, out_channel2=8)
    packed = pack_params(params)       # one-time packing (BN folded, bf16)

    # Smallest depth surviving both pools + the final VALID 3x3x3 conv is 32.
    B, D, H, W = 2, 32, 8, 8
    x = jax.random.normal(kx, (B, D, H, W), jnp.float32)

    fwd = jax.jit(d_res_3d_cnn_fwd)
    out = jax.block_until_ready(fwd(x, params if False else packed))
    assert out.shape == (B, 32), out.shape

    ref = reference_fwd(x, params)
    err = float(jnp.max(jnp.abs(out - ref)))
    scale = float(jnp.max(jnp.abs(ref))) + 1e-6
    # bf16 MXU operands (f32 accumulation) -> allow a few percent of the output
    # scale; structural bugs produce errors of order `scale` itself.
    if not err <= 0.08 * scale:
        raise AssertionError(
            f"Pallas output mismatch vs reference: max|err|={err}, max|ref|={scale}")
    print("KERNEL_OK")
</pallas_src>

<mosaic_0001>
module attributes {stable_mosaic.version = 11 : i64} {
  func.func @k(%arg0: memref<8x128xf32, #tpu.memory_space<vmem>>, %arg1: memref<8x128xf32, #tpu.memory_space<vmem>>) attributes {dimension_semantics = [], scalar_prefetch = 0 : i64, scratch_operands = 0 : i64, tpu.core_type = #tpu.core_type<tc>} {
    %c0 = arith.constant 0 : index
    %c0_0 = arith.constant 0 : index
    %0 = vector.load %arg0[%c0, %c0_0] : memref<8x128xf32, #tpu.memory_space<vmem>>, vector<8x128xf32>
    %c1_i32 = arith.constant 1 : i32
    %1 = tpu.dynamic_rotate %0 by %c1_i32 dim 1 : vector<8x128xf32>, i32 -> vector<8x128xf32>
    %c0_1 = arith.constant 0 : index
    %c0_2 = arith.constant 0 : index
    %2 = vector.load %arg1[%c0_1, %c0_2] : memref<8x128xf32, #tpu.memory_space<vmem>>, vector<8x128xf32>
    tpu.vector_store %arg1[%c0_1, %c0_2], %1 {strides = array<i32>} : memref<8x128xf32, #tpu.memory_space<vmem>>, vector<8x128xf32>,
    return
  }
}

</mosaic_0001>

<bundles_post_ra>
// kernel: tpu_custom_call.1
= control target key start
LH: loop header
LB: loop body
LE: loop exit
PB: predicated region body
PF: predicated region fallthrough
CT: control target
= control target key end

     0   :  { %6 = vsyncpa [#allocation3], 0  ;;  %s106_s0 = inlined_call_operand.hbm [shape: f32[8,128], index: 0, kind: input, shape index: {}]   ;;  %s107_s1 = inlined_call_operand.hbm [shape: f32[8,128], index: 1, kind: output, shape index: {}]  }
   0x1   :  { %7 = vsyncpa [#allocation4], 0  ;;  %s87_s6 = smov [#allocation2]  }
   0x2   :  { %s14_s7 = sshll.u32 %s87_s6, 4  ;;  %s15_s7 = int_to_ptr.vmem [resolvable:$true] %s14_s7 }
   0x3   :  { %s51_s8 = scalar_lea.vmem %s15_s7, 128  ;;  %p56_p1 = scmp.lt.s32.totalorder %s15_s7, %s15_s7 }
   0x4   :  { %p52_p0 = scmp.ne.s32.totalorder %s15_s7, %s51_s8  ;;  %p57_p2 = scmp.lt.s32.totalorder %s51_s8, %s51_s8 }
   0x6   :  { %p58_p3 = por %p57_p2, %p56_p1 }
   0x8   :  { %p59_p4 = pnand %p58_p3, %p52_p0 }
   0xa   :  { %62 = shalt.err (!%p59_p4)
}
   0xb   :  { %17 = dma.hbm_to_vmem [thread:$0]  %s106_s0, 128, %s15_s7, [#allocation3]  }
   0xc   :  { %83 = dma.done.wait [#allocation3], 128  }
   0xd   :  { %84 = vsyncadd [#allocation3], 4294967168  ;;  %v21_v0 = vld [vmem:[#allocation2] sm:$0xff]  ;;  %s88_s11 = smov 1   ;;  %s89_s12 = smov [#allocation5]  }
   0xe   :  { %22 = vrot.lane.b32.xlu0 %v21_v0, %s88_s11  ;;  %s31_s13 = sshll.u32 %s89_s12, 4  ;;  %s32_s13 = int_to_ptr.vmem [resolvable:$true] %s31_s13 }
   0xf   :  { %s63_s14 = scalar_lea.vmem %s32_s13, 128  ;;  %p68_p6 = scmp.lt.s32.totalorder %s32_s13, %s32_s13 }
  0x10   :  { %p64_p5 = scmp.ne.s32.totalorder %s32_s13, %s63_s14  ;;  %p69_p7 = scmp.lt.s32.totalorder %s63_s14, %s63_s14 }
  0x12   :  { %p70_p8 = por %p69_p7, %p68_p6 }
  0x14   :  { %p71_p9 = pnand %p70_p8, %p64_p5 }
  0x80   :  { %v23_v1 = vpop.permute.xlu0 %22 }
  0x81   :  { %24 = vst [vmem:[#allocation5] sm:$0xff] %v23_v1 }
  0x82   :  { %74 = shalt.err (!%p71_p9)
}
  0x83   :  { %34 = dma.vmem_to_hbm [thread:$0]  %s32_s13, 128, %s107_s1, [#allocation4]  }
  0x84   :  { %85 = dma.done.wait [#allocation4], 128  }
  0x85   :  { %86 = vsyncadd [#allocation4], 4294967168 }
  0x86   :  { %38 = vsyncpa [#allocation3], 1 }
  0x87   :  { %39 = vsyncpa [#allocation4], 1 }

</bundles_post_ra>
